<compile_context>
chip_gen: v6e
topology: v6e:2x2x1
jax: 0.10.0
libtpu: 0.0.40
codegen_flags: <defaults>
</compile_context>

<pallas_src>
import functools

import jax
import jax.numpy as jnp
import numpy as np
from jax.experimental import pallas as pl
from jax.experimental.pallas import tpu as pltpu

EPS = 1e-5


# ---------------------------------------------------------------------------
# Fused kernel: whole Bottleneck forward for one sample.
# ---------------------------------------------------------------------------
def _bottleneck_kernel(x_ref, w1_ref, w2_ref, w3_ref, sb_ref, o_ref, xp_ref,
                       *, H, W, half):
    """Fused Bottleneck forward for one sample.

    x_ref : (H*W, Cin)        input (NHWC, spatial flattened) -- also the residual
    w1_ref: (Cin, P)          1x1 conv1 weight, BN1 scale pre-folded into cols >= half
    w2_ref: (3, 3P, P)        3x3 conv2 weight, kw folded into K, BN2 scale pre-folded
    w3_ref: (P, 4P)           1x1 conv3 weight, BN3 scale pre-folded
    sb_ref: (5, 4P) f32       packed per-channel vectors:
                              row0 IN gamma, row1 IN beta (cols < half, rest 0)
                              row2 BN1 bias, row3 BN2 bias (first P cols)
                              row4 BN3 bias
    o_ref : (H*W, 4P)         output
    xp_ref: (H+2, W, 3P)      VMEM scratch: zero-padded, kw-pre-folded stage-1
                              activation in the compute dtype.
    """
    HW = H * W
    P = w1_ref.shape[1]
    cdt = x_ref.dtype                      # matmul compute dtype (f32 or bf16)

    # ---- Stage 1: 1x1 conv + (IBN | BN) + ReLU (f32 accumulation) ----------
    x = x_ref[...]                                               # (HW, Cin)
    y1 = jnp.dot(x, w1_ref[...], preferred_element_type=jnp.float32)
    t1 = sb_ref[2:3, :P]
    y_bn = y1 + t1                         # BN1 scale already folded into w1
    if half > 0:
        # Two-pass instance-norm statistics over the spatial axis.
        inv_hw = 1.0 / HW
        mean = jnp.sum(y1, axis=0, keepdims=True) * inv_hw
        d = y1 - mean
        var = jnp.sum(d * d, axis=0, keepdims=True) * inv_hw
        g = sb_ref[0:1, :P]
        b = sb_ref[1:2, :P]
        y_in = d * jax.lax.rsqrt(var + EPS) * g + b
        ch = jax.lax.broadcasted_iota(jnp.int32, y1.shape, 1)
        y1 = jnp.where(ch < half, y_in, y_bn)
    else:
        y1 = y_bn
    y1 = jnp.maximum(y1, 0.0)

    # ---- Stage 2: 3x3 conv (stride 1, pad 1) + BN + ReLU --------------------
    # Build the padded activation once, already in the kw-folded layout:
    #   xp[r, w, kw*P + c] == zero-padded y1[r-1, w+kw-1, c]
    # so each kh step is a plain contiguous (HW, 3P) read feeding the MXU.
    # Only the 1-element border needs zeroing; the interior is overwritten.
    zr = jnp.zeros((1, W, 3 * P), cdt)
    xp_ref[0:1] = zr                                           # top padding row
    xp_ref[H + 1:H + 2] = zr                                   # bottom padding row
    zc = jnp.zeros((H, 1, P), cdt)
    xp_ref[1:H + 1, 0:1, 0:P] = zc                             # left pad of kw=0 tap
    xp_ref[1:H + 1, W - 1:W, 2 * P:3 * P] = zc                 # right pad of kw=2 tap

    y1t = y1.astype(cdt).reshape(H, W, P)
    xp_ref[1:H + 1, :, P:2 * P] = y1t                          # kw = 1 (center)
    xp_ref[1:H + 1, 1:W, 0:P] = y1t[:, 0:W - 1, :]             # kw = 0 (left tap)
    xp_ref[1:H + 1, 0:W - 1, 2 * P:3 * P] = y1t[:, 1:W, :]     # kw = 2 (right tap)

    acc = jnp.dot(xp_ref[0:H].reshape(HW, 3 * P), w2_ref[0],
                  preferred_element_type=jnp.float32)
    for kh in (1, 2):                                          # unrolled
        acc = acc + jnp.dot(xp_ref[kh:kh + H].reshape(HW, 3 * P), w2_ref[kh],
                            preferred_element_type=jnp.float32)
    t2 = sb_ref[3:4, :P]
    y2 = jnp.maximum(acc + t2, 0.0)        # BN2 scale already folded into w2

    # ---- Stage 3: 1x1 conv + BN + residual add + ReLU -----------------------
    y3 = jnp.dot(y2.astype(cdt), w3_ref[...], preferred_element_type=jnp.float32)
    y3 = y3 + sb_ref[4:5, :] + x.astype(jnp.float32)
    o_ref[...] = jnp.maximum(y3, 0.0).astype(o_ref.dtype)


# ---------------------------------------------------------------------------
# NHWC-native wrapper (no layout transposes)
# ---------------------------------------------------------------------------
def bottleneck_forward_nhwc(x_nhwc, params, *, with_ibn=False,
                            compute_dtype=jnp.float32, out_dtype=None,
                            alias_residual=False):
    N, H, W, Cin = x_nhwc.shape
    P = params["w1"].shape[1]
    Cout = 4 * P
    assert Cin == Cout, "downsample=None requires inplanes == planes * 4"
    HW = H * W
    half = P // 2 if with_ibn else 0
    out_dtype = jnp.float32 if out_dtype is None else out_dtype
    if alias_residual:
        assert jnp.dtype(out_dtype) == jnp.dtype(compute_dtype), \
            "residual aliasing requires matching in/out dtypes"

    x_flat = x_nhwc.reshape(N, HW, Cin).astype(compute_dtype)

    # ---- host-side weight prep: fold eval-mode BN scales into the weights ---
    s1 = params["bn1_scale"].reshape(-1)
    # Do NOT fold into the IN half of w1 (IN's EPS breaks exact scale invariance).
    fold1 = jnp.where(jnp.arange(P) < half, 1.0, s1) if half > 0 else s1
    w1 = (params["w1"] * fold1[None, :]).astype(compute_dtype)
    # Fold kw into the contraction dim: (3,3,C,Cout) -> (3, 3C, Cout),
    # row index = kw*C + cin, matching the in-kernel scratch column order.
    w2 = (params["w2"] * params["bn2_scale"].reshape(-1))
    w2 = w2.reshape(3, 3 * P, P).astype(compute_dtype)
    w3 = (params["w3"] * params["bn3_scale"].reshape(-1)).astype(compute_dtype)

    # ---- pack the per-channel bias / IN-affine vectors into one array -------
    def _pad_row(v):
        v = v.reshape(-1)
        return jnp.pad(v, (0, Cout - v.shape[0]))
    sb = jnp.stack([
        _pad_row(params["in_gamma"]),
        _pad_row(params["in_beta"]),
        _pad_row(params["bn1_bias"]),
        _pad_row(params["bn2_bias"]),
        params["bn3_bias"].reshape(-1),
    ]).astype(jnp.float32)                                     # (5, Cout)

    kernel = functools.partial(_bottleneck_kernel, H=H, W=W, half=half)

    out = pl.pallas_call(
        kernel,
        grid=(N,),
        in_specs=[
            pl.BlockSpec((None, HW, Cin), lambda n: (n, 0, 0)),     # x / residual
            pl.BlockSpec((Cin, P), lambda n: (0, 0)),               # w1 (s1-folded)
            pl.BlockSpec((3, 3 * P, P), lambda n: (0, 0, 0)),       # w2 (kw+s2-folded)
            pl.BlockSpec((P, Cout), lambda n: (0, 0)),              # w3 (s3-folded)
            pl.BlockSpec((5, Cout), lambda n: (0, 0)),              # packed biases/IN
        ],
        out_specs=pl.BlockSpec((None, HW, Cout), lambda n: (n, 0, 0)),
        out_shape=jax.ShapeDtypeStruct((N, HW, Cout), out_dtype),
        scratch_shapes=[pltpu.VMEM((H + 2, W, 3 * P), compute_dtype)],
        compiler_params=pltpu.CompilerParams(
            dimension_semantics=("parallel",),        # shard samples across TCs
            vmem_limit_bytes=48 * 1024 * 1024),
        input_output_aliases=({0: 0} if alias_residual else {}),
    )(x_flat, w1, w2, w3, sb)

    return out.reshape(N, H, W, Cout)


# NCHW wrapper kept only for parity with the PyTorch module.
# TODO(synk): keep the surrounding network NHWC end-to-end to drop these two
#             full-tensor HBM round trips.
def bottleneck_forward(x_nchw, params, **kwargs):
    x_nhwc = jnp.transpose(x_nchw, (0, 2, 3, 1))
    y = bottleneck_forward_nhwc(x_nhwc, params, **kwargs)
    return jnp.transpose(y, (0, 3, 1, 2))


# ---------------------------------------------------------------------------
# Deterministic parameter construction (BN folded to eval-mode scale/bias)
# ---------------------------------------------------------------------------
def _fold_bn(kg, kb, km, kv, c):
    gamma = 1.0 + 0.1 * jax.random.normal(kg, (c,), jnp.float32)
    beta = 0.1 * jax.random.normal(kb, (c,), jnp.float32)
    rmean = 0.1 * jax.random.normal(km, (c,), jnp.float32)
    rvar = 1.0 + 0.1 * jax.random.uniform(kv, (c,), jnp.float32)
    scale = gamma * jax.lax.rsqrt(rvar + EPS)
    bias = beta - rmean * scale
    return scale, bias


def init_params(key, inplanes, planes, *, with_ibn=False):
    ks = jax.random.split(key, 20)
    p = {}
    p["w1"] = (jax.random.normal(ks[0], (inplanes, planes), jnp.float32)
               * (2.0 / inplanes) ** 0.5)
    p["w2"] = (jax.random.normal(ks[1], (3, 3, planes, planes), jnp.float32)
               * (2.0 / (9 * planes)) ** 0.5)
    p["w3"] = (jax.random.normal(ks[2], (planes, 4 * planes), jnp.float32)
               * (2.0 / planes) ** 0.5)

    if with_ibn:
        half = planes // 2
        half2 = planes - half
        in_g = 1.0 + 0.1 * jax.random.normal(ks[3], (half,), jnp.float32)
        in_b = 0.1 * jax.random.normal(ks[4], (half,), jnp.float32)
        bn_s, bn_b = _fold_bn(ks[5], ks[6], ks[7], ks[8], half2)
        p["in_gamma"] = jnp.concatenate([in_g, jnp.zeros((half2,), jnp.float32)]).reshape(1, planes)
        p["in_beta"] = jnp.concatenate([in_b, jnp.zeros((half2,), jnp.float32)]).reshape(1, planes)
        p["bn1_scale"] = jnp.concatenate([jnp.zeros((half,), jnp.float32), bn_s]).reshape(1, planes)
        p["bn1_bias"] = jnp.concatenate([jnp.zeros((half,), jnp.float32), bn_b]).reshape(1, planes)
    else:
        bn_s, bn_b = _fold_bn(ks[5], ks[6], ks[7], ks[8], planes)
        p["in_gamma"] = jnp.zeros((1, planes), jnp.float32)
        p["in_beta"] = jnp.zeros((1, planes), jnp.float32)
        p["bn1_scale"] = bn_s.reshape(1, planes)
        p["bn1_bias"] = bn_b.reshape(1, planes)

    s2, b2 = _fold_bn(ks[9], ks[10], ks[11], ks[12], planes)
    p["bn2_scale"], p["bn2_bias"] = s2.reshape(1, planes), b2.reshape(1, planes)
    s3, b3 = _fold_bn(ks[13], ks[14], ks[15], ks[16], 4 * planes)
    p["bn3_scale"], p["bn3_bias"] = s3.reshape(1, 4 * planes), b3.reshape(1, 4 * planes)
    return p


# ---------------------------------------------------------------------------
# Pure-JAX reference (same math, used for a correctness check)
# ---------------------------------------------------------------------------
def ref_forward(x_nchw, params, *, with_ibn=False):
    PREC = jax.lax.Precision.HIGHEST
    N, Cin, H, W = x_nchw.shape
    planes = params["w1"].shape[1]
    half = planes // 2 if with_ibn else 0
    x = jnp.transpose(x_nchw, (0, 2, 3, 1)).astype(jnp.float32)   # NHWC

    y = jnp.einsum("nhwc,cd->nhwd", x, params["w1"], precision=PREC)
    y_bn = y * params["bn1_scale"][0] + params["bn1_bias"][0]
    if half > 0:
        mean = jnp.mean(y, axis=(1, 2), keepdims=True)
        var = jnp.mean((y - mean) ** 2, axis=(1, 2), keepdims=True)
        y_in = (y - mean) * jax.lax.rsqrt(var + EPS) * params["in_gamma"][0] + params["in_beta"][0]
        y = jnp.where(jnp.arange(planes) < half, y_in, y_bn)
    else:
        y = y_bn
    y = jnp.maximum(y, 0.0)

    yp = jnp.pad(y, ((0, 0), (1, 1), (1, 1), (0, 0)))
    acc = jnp.zeros((N, H, W, planes), jnp.float32)
    for kh in range(3):
        for kw in range(3):
            acc = acc + jnp.einsum("nhwc,cd->nhwd",
                                   yp[:, kh:kh + H, kw:kw + W, :],
                                   params["w2"][kh, kw], precision=PREC)
    y = jnp.maximum(acc * params["bn2_scale"][0] + params["bn2_bias"][0], 0.0)

    y = jnp.einsum("nhwc,cd->nhwd", y, params["w3"], precision=PREC)
    y = y * params["bn3_scale"][0] + params["bn3_bias"][0] + x
    y = jnp.maximum(y, 0.0)
    return jnp.transpose(y, (0, 3, 1, 2))


# ---------------------------------------------------------------------------
if __name__ == "__main__":
    # planes=32 -> Cout=128: lane-dense output / unmasked stores (per review).
    N, planes, H, W = 2, 32, 8, 8
    inplanes = planes * 4          # downsample=None requires this
    key = jax.random.PRNGKey(0)
    kx, kp1, kp2 = jax.random.split(key, 3)

    x = jax.random.normal(kx, (N, inplanes, H, W), jnp.float32)

    # Plain BatchNorm path (with_ibn=False, the module default), f32 matmuls.
    params_bn = init_params(kp1, inplanes, planes, with_ibn=False)
    out_bn = jax.block_until_ready(bottleneck_forward(x, params_bn, with_ibn=False))
    ref_bn = jax.block_until_ready(ref_forward(x, params_bn, with_ibn=False))
    np.testing.assert_allclose(np.asarray(out_bn), np.asarray(ref_bn),
                               rtol=1e-2, atol=1e-2)

    # IBN path (with_ibn=True) exercises the in-kernel instance-norm reduction.
    params_ibn = init_params(kp2, inplanes, planes, with_ibn=True)
    out_ibn = jax.block_until_ready(bottleneck_forward(x, params_ibn, with_ibn=True))
    ref_ibn = jax.block_until_ready(ref_forward(x, params_ibn, with_ibn=True))
    np.testing.assert_allclose(np.asarray(out_ibn), np.asarray(ref_ibn),
                               rtol=1e-2, atol=1e-2)

    # NHWC-native entry (no wrapper transposes).
    x_nhwc = jnp.transpose(x, (0, 2, 3, 1))
    out_nhwc = jax.block_until_ready(
        bottleneck_forward_nhwc(x_nhwc, params_bn, with_ibn=False))
    np.testing.assert_allclose(np.asarray(jnp.transpose(out_nhwc, (0, 3, 1, 2))),
                               np.asarray(ref_bn), rtol=1e-2, atol=1e-2)

    # Residual-aliased f32 path: output HBM buffer reuses the x_flat buffer.
    fwd_alias = jax.jit(functools.partial(bottleneck_forward,
                                          with_ibn=False, alias_residual=True))
    out_alias = jax.block_until_ready(fwd_alias(x, params_bn))
    np.testing.assert_allclose(np.asarray(out_alias), np.asarray(ref_bn),
                               rtol=1e-2, atol=1e-2)

    # bf16 matmul/scratch path (halves HBM/VMEM traffic on v6e/v7x); f32
    # accumulation and epilogue, so only a loose comparison vs the f32 reference.
    out_bf16 = jax.block_until_ready(
        bottleneck_forward(x, params_bn, with_ibn=False,
                           compute_dtype=jnp.bfloat16))
    np.testing.assert_allclose(np.asarray(out_bf16), np.asarray(ref_bn),
                               rtol=5e-2, atol=1.5e-1)

    assert out_bn.shape == (N, inplanes, H, W)
    print("KERNEL_OK")
</pallas_src>

<mosaic_0001>
module attributes {stable_mosaic.version = 11 : i64} {
  func.func @_bottleneck_kernel(%arg0: i32, %arg1: memref<1x64x128xf32, #tpu.memory_space<vmem>>, %arg2: memref<128x32xf32, #tpu.memory_space<vmem>>, %arg3: memref<3x96x32xf32, #tpu.memory_space<vmem>>, %arg4: memref<32x128xf32, #tpu.memory_space<vmem>>, %arg5: memref<5x128xf32, #tpu.memory_space<vmem>>, %arg6: memref<1x64x128xf32, #tpu.memory_space<vmem>>, %arg7: memref<10x8x96xf32, #tpu.memory_space<vmem>>) attributes {dimension_semantics = [#tpu.dimension_semantics<parallel>], iteration_bounds = array<i64: 2>, scalar_prefetch = 0 : i64, scratch_operands = 1 : i64, tpu.core_type = #tpu.core_type<tc>, window_params = [{transform_indices = @transform_0, window_bounds = array<i64: 1, 64, 128>}, {pipeline_mode = #tpu.pipeline_mode<synchronous>, transform_indices = @transform_1, window_bounds = array<i64: 128, 32>}, {pipeline_mode = #tpu.pipeline_mode<synchronous>, transform_indices = @transform_2, window_bounds = array<i64: 3, 96, 32>}, {pipeline_mode = #tpu.pipeline_mode<synchronous>, transform_indices = @transform_3, window_bounds = array<i64: 32, 128>}, {pipeline_mode = #tpu.pipeline_mode<synchronous>, transform_indices = @transform_4, window_bounds = array<i64: 5, 128>}, {transform_indices = @transform_5, window_bounds = array<i64: 1, 64, 128>}]} {
    %c0 = arith.constant 0 : index
    %c0_0 = arith.constant 0 : index
    %c0_1 = arith.constant 0 : index
    %0 = vector.load %arg1[%c0, %c0_0, %c0_1] : memref<1x64x128xf32, #tpu.memory_space<vmem>>, vector<1x64x128xf32>
    %1 = vector.shape_cast %0 : vector<1x64x128xf32> to vector<64x128xf32>
    %c0_2 = arith.constant 0 : index
    %c0_3 = arith.constant 0 : index
    %2 = vector.load %arg2[%c0_2, %c0_3] : memref<128x32xf32, #tpu.memory_space<vmem>>, vector<128x32xf32>
    %cst = arith.constant dense<0.000000e+00> : vector<64x32xf32>
    %3 = tpu.matmul %1, %2, %cst {dimension_numbers = #tpu.dot_dimension_numbers<[1], [0], [0], [1], [0, 0, 1, 1], [], []>} : vector<64x128xf32>, vector<128x32xf32>, vector<64x32xf32> -> vector<64x32xf32>
    %c2 = arith.constant 2 : index
    %c0_4 = arith.constant 0 : index
    %4 = vector.load %arg5[%c2, %c0_4] : memref<5x128xf32, #tpu.memory_space<vmem>>, vector<1x32xf32>
    %5 = vector.broadcast %4 : vector<1x32xf32> to vector<64x32xf32>
    %6 = arith.addf %3, %5 : vector<64x32xf32>
    %cst_5 = arith.constant 0.000000e+00 : f32
    %7 = vector.broadcast %cst_5 : f32 to vector<64x32xf32>
    %8 = arith.maximumf %6, %7 : vector<64x32xf32>
    %cst_6 = arith.constant 0.000000e+00 : f32
    %9 = vector.broadcast %cst_6 : f32 to vector<1x8x96xf32>
    %c0_7 = arith.constant 0 : index
    %c0_8 = arith.constant 0 : index
    %c0_9 = arith.constant 0 : index
    %10 = vector.load %arg7[%c0_7, %c0_8, %c0_9] : memref<10x8x96xf32, #tpu.memory_space<vmem>>, vector<1x8x96xf32>
    tpu.vector_store %arg7[%c0_7, %c0_8, %c0_9], %9 {strides = array<i32>} : memref<10x8x96xf32, #tpu.memory_space<vmem>>, vector<1x8x96xf32>,
    %c9 = arith.constant 9 : index
    %c0_10 = arith.constant 0 : index
    %c0_11 = arith.constant 0 : index
    %11 = vector.load %arg7[%c9, %c0_10, %c0_11] : memref<10x8x96xf32, #tpu.memory_space<vmem>>, vector<1x8x96xf32>
    tpu.vector_store %arg7[%c9, %c0_10, %c0_11], %9 {strides = array<i32>} : memref<10x8x96xf32, #tpu.memory_space<vmem>>, vector<1x8x96xf32>,
    %cst_12 = arith.constant 0.000000e+00 : f32
    %12 = vector.broadcast %cst_12 : f32 to vector<8x1x32xf32>
    %c1 = arith.constant 1 : index
    %c0_13 = arith.constant 0 : index
    %c0_14 = arith.constant 0 : index
    %13 = vector.load %arg7[%c1, %c0_13, %c0_14] : memref<10x8x96xf32, #tpu.memory_space<vmem>>, vector<8x1x32xf32>
    tpu.vector_store %arg7[%c1, %c0_13, %c0_14], %12 {strides = array<i32>} : memref<10x8x96xf32, #tpu.memory_space<vmem>>, vector<8x1x32xf32>,
    %c1_15 = arith.constant 1 : index
    %c7 = arith.constant 7 : index
    %c64 = arith.constant 64 : index
    %14 = vector.load %arg7[%c1_15, %c7, %c64] : memref<10x8x96xf32, #tpu.memory_space<vmem>>, vector<8x1x32xf32>
    tpu.vector_store %arg7[%c1_15, %c7, %c64], %12 {strides = array<i32>} : memref<10x8x96xf32, #tpu.memory_space<vmem>>, vector<8x1x32xf32>,
    %15 = vector.shape_cast %8 : vector<64x32xf32> to vector<8x8x32xf32>
    %c1_16 = arith.constant 1 : index
    %c0_17 = arith.constant 0 : index
    %c32 = arith.constant 32 : index
    %16 = vector.load %arg7[%c1_16, %c0_17, %c32] : memref<10x8x96xf32, #tpu.memory_space<vmem>>, vector<8x8x32xf32>
    tpu.vector_store %arg7[%c1_16, %c0_17, %c32], %15 {strides = array<i32>} : memref<10x8x96xf32, #tpu.memory_space<vmem>>, vector<8x8x32xf32>,
    %17 = vector.extract_strided_slice %15 {offsets = [0, 0, 0], sizes = [8, 7, 32], strides = [1, 1, 1]} : vector<8x8x32xf32> to vector<8x7x32xf32>
    %c1_18 = arith.constant 1 : index
    %c1_19 = arith.constant 1 : index
    %c0_20 = arith.constant 0 : index
    %18 = vector.load %arg7[%c1_18, %c1_19, %c0_20] : memref<10x8x96xf32, #tpu.memory_space<vmem>>, vector<8x7x32xf32>
    tpu.vector_store %arg7[%c1_18, %c1_19, %c0_20], %17 {strides = array<i32>} : memref<10x8x96xf32, #tpu.memory_space<vmem>>, vector<8x7x32xf32>,
    %19 = vector.extract_strided_slice %15 {offsets = [0, 1, 0], sizes = [8, 7, 32], strides = [1, 1, 1]} : vector<8x8x32xf32> to vector<8x7x32xf32>
    %c1_21 = arith.constant 1 : index
    %c0_22 = arith.constant 0 : index
    %c64_23 = arith.constant 64 : index
    %20 = vector.load %arg7[%c1_21, %c0_22, %c64_23] : memref<10x8x96xf32, #tpu.memory_space<vmem>>, vector<8x7x32xf32>
    tpu.vector_store %arg7[%c1_21, %c0_22, %c64_23], %19 {strides = array<i32>} : memref<10x8x96xf32, #tpu.memory_space<vmem>>, vector<8x7x32xf32>,
    %c0_24 = arith.constant 0 : index
    %c0_25 = arith.constant 0 : index
    %c0_26 = arith.constant 0 : index
    %21 = vector.load %arg7[%c0_24, %c0_25, %c0_26] : memref<10x8x96xf32, #tpu.memory_space<vmem>>, vector<8x8x96xf32>
    %22 = vector.shape_cast %21 : vector<8x8x96xf32> to vector<64x96xf32>
    %c0_27 = arith.constant 0 : index
    %c0_28 = arith.constant 0 : index
    %c0_29 = arith.constant 0 : index
    %23 = vector.load %arg3[%c0_27, %c0_28, %c0_29] : memref<3x96x32xf32, #tpu.memory_space<vmem>>, vector<1x96x32xf32>
    %24 = vector.shape_cast %23 : vector<1x96x32xf32> to vector<96x32xf32>
    %cst_30 = arith.constant dense<0.000000e+00> : vector<64x32xf32>
    %25 = tpu.matmul %22, %24, %cst_30 {dimension_numbers = #tpu.dot_dimension_numbers<[1], [0], [0], [1], [0, 0, 1, 1], [], []>} : vector<64x96xf32>, vector<96x32xf32>, vector<64x32xf32> -> vector<64x32xf32>
    %c1_31 = arith.constant 1 : index
    %c0_32 = arith.constant 0 : index
    %c0_33 = arith.constant 0 : index
    %26 = vector.load %arg7[%c1_31, %c0_32, %c0_33] : memref<10x8x96xf32, #tpu.memory_space<vmem>>, vector<8x8x96xf32>
    %27 = vector.shape_cast %26 : vector<8x8x96xf32> to vector<64x96xf32>
    %c1_34 = arith.constant 1 : index
    %c0_35 = arith.constant 0 : index
    %c0_36 = arith.constant 0 : index
    %28 = vector.load %arg3[%c1_34, %c0_35, %c0_36] : memref<3x96x32xf32, #tpu.memory_space<vmem>>, vector<1x96x32xf32>
    %29 = vector.shape_cast %28 : vector<1x96x32xf32> to vector<96x32xf32>
    %cst_37 = arith.constant dense<0.000000e+00> : vector<64x32xf32>
    %30 = tpu.matmul %27, %29, %cst_37 {dimension_numbers = #tpu.dot_dimension_numbers<[1], [0], [0], [1], [0, 0, 1, 1], [], []>} : vector<64x96xf32>, vector<96x32xf32>, vector<64x32xf32> -> vector<64x32xf32>
    %31 = arith.addf %25, %30 : vector<64x32xf32>
    %c2_38 = arith.constant 2 : index
    %c0_39 = arith.constant 0 : index
    %c0_40 = arith.constant 0 : index
    %32 = vector.load %arg7[%c2_38, %c0_39, %c0_40] : memref<10x8x96xf32, #tpu.memory_space<vmem>>, vector<8x8x96xf32>
    %33 = vector.shape_cast %32 : vector<8x8x96xf32> to vector<64x96xf32>
    %c2_41 = arith.constant 2 : index
    %c0_42 = arith.constant 0 : index
    %c0_43 = arith.constant 0 : index
    %34 = vector.load %arg3[%c2_41, %c0_42, %c0_43] : memref<3x96x32xf32, #tpu.memory_space<vmem>>, vector<1x96x32xf32>
    %35 = vector.shape_cast %34 : vector<1x96x32xf32> to vector<96x32xf32>
    %cst_44 = arith.constant dense<0.000000e+00> : vector<64x32xf32>
    %36 = tpu.matmul %33, %35, %cst_44 {dimension_numbers = #tpu.dot_dimension_numbers<[1], [0], [0], [1], [0, 0, 1, 1], [], []>} : vector<64x96xf32>, vector<96x32xf32>, vector<64x32xf32> -> vector<64x32xf32>
    %37 = arith.addf %31, %36 : vector<64x32xf32>
    %c3 = arith.constant 3 : index
    %c0_45 = arith.constant 0 : index
    %38 = vector.load %arg5[%c3, %c0_45] : memref<5x128xf32, #tpu.memory_space<vmem>>, vector<1x32xf32>
    %39 = vector.broadcast %38 : vector<1x32xf32> to vector<64x32xf32>
    %40 = arith.addf %37, %39 : vector<64x32xf32>
    %cst_46 = arith.constant 0.000000e+00 : f32
    %41 = vector.broadcast %cst_46 : f32 to vector<64x32xf32>
    %42 = arith.maximumf %40, %41 : vector<64x32xf32>
    %c0_47 = arith.constant 0 : index
    %c0_48 = arith.constant 0 : index
    %43 = vector.load %arg4[%c0_47, %c0_48] : memref<32x128xf32, #tpu.memory_space<vmem>>, vector<32x128xf32>
    %cst_49 = arith.constant dense<0.000000e+00> : vector<64x128xf32>
    %44 = tpu.matmul %42, %43, %cst_49 {dimension_numbers = #tpu.dot_dimension_numbers<[1], [0], [0], [1], [0, 0, 1, 1], [], []>} : vector<64x32xf32>, vector<32x128xf32>, vector<64x128xf32> -> vector<64x128xf32>
    %c4 = arith.constant 4 : index
    %c0_50 = arith.constant 0 : index
    %45 = vector.load %arg5[%c4, %c0_50] : memref<5x128xf32, #tpu.memory_space<vmem>>, vector<1x128xf32>
    %46 = vector.broadcast %45 : vector<1x128xf32> to vector<64x128xf32>
    %47 = arith.addf %44, %46 : vector<64x128xf32>
    %48 = arith.addf %47, %1 : vector<64x128xf32>
    %cst_51 = arith.constant 0.000000e+00 : f32
    %49 = vector.broadcast %cst_51 : f32 to vector<64x128xf32>
    %50 = arith.maximumf %48, %49 : vector<64x128xf32>
    %c0_52 = arith.constant 0 : index
    %c0_53 = arith.constant 0 : index
    %c0_54 = arith.constant 0 : index
    %51 = vector.load %arg6[%c0_52, %c0_53, %c0_54] : memref<1x64x128xf32, #tpu.memory_space<vmem>>, vector<1x64x128xf32>
    %52 = vector.shape_cast %51 : vector<1x64x128xf32> to vector<64x128xf32>
    %53 = vector.shape_cast %50 : vector<64x128xf32> to vector<1x64x128xf32>
    tpu.vector_store %arg6[%c0_52, %c0_53, %c0_54], %53 {strides = array<i32>} : memref<1x64x128xf32, #tpu.memory_space<vmem>>, vector<1x64x128xf32>,
    return
  }
  func.func @transform_0(%arg0: i32) -> (i32, i32, i32) {
    %c0_i32 = arith.constant 0 : i32
    %c0_i32_0 = arith.constant 0 : i32
    %c0_i32_1 = arith.constant 0 : i32
    return %arg0, %c0_i32, %c0_i32_0 : i32, i32, i32
  }
  func.func @transform_1(%arg0: i32) -> (i32, i32) {
    %c0_i32 = arith.constant 0 : i32
    %c0_i32_0 = arith.constant 0 : i32
    %c0_i32_1 = arith.constant 0 : i32
    return %c0_i32, %c0_i32_0 : i32, i32
  }
  func.func @transform_2(%arg0: i32) -> (i32, i32, i32) {
    %c0_i32 = arith.constant 0 : i32
    %c0_i32_0 = arith.constant 0 : i32
    %c0_i32_1 = arith.constant 0 : i32
    %c0_i32_2 = arith.constant 0 : i32
    return %c0_i32, %c0_i32_0, %c0_i32_1 : i32, i32, i32
  }
  func.func @transform_3(%arg0: i32) -> (i32, i32) {
    %c0_i32 = arith.constant 0 : i32
    %c0_i32_0 = arith.constant 0 : i32
    %c0_i32_1 = arith.constant 0 : i32
    return %c0_i32, %c0_i32_0 : i32, i32
  }
  func.func @transform_4(%arg0: i32) -> (i32, i32) {
    %c0_i32 = arith.constant 0 : i32
    %c0_i32_0 = arith.constant 0 : i32
    %c0_i32_1 = arith.constant 0 : i32
    return %c0_i32, %c0_i32_0 : i32, i32
  }
  func.func @transform_5(%arg0: i32) -> (i32, i32, i32) {
    %c0_i32 = arith.constant 0 : i32
    %c0_i32_0 = arith.constant 0 : i32
    %c0_i32_1 = arith.constant 0 : i32
    return %arg0, %c0_i32, %c0_i32_0 : i32, i32, i32
  }
}

</mosaic_0001>

<bundles_post_ra>
// kernel: tpu_custom_call.1
= control target key start
LH: loop header
LB: loop body
LE: loop exit
PB: predicated region body
PF: predicated region fallthrough
CT: control target
= control target key end

     0   :  { %10 = vsyncpa [#allocation4], 0  ;;  %s2146_s0 = inlined_call_operand.vmem [shape: f32[2,64,128], index: 0, kind: input, shape index: {}]   ;;  %s2147_s1 = inlined_call_operand.vmem [shape: f32[128,32], index: 1, kind: input, shape index: {}]   ;;  %s2148_s2 = inlined_call_operand.vmem [shape: f32[3,96,32], index: 2, kind: input, shape index: {}]   ;;  %s2149_s3 = inlined_call_operand.vmem [shape: f32[32,128], index: 3, kind: input, shape index: {}]   ;;  %s2150_s4 = inlined_call_operand.vmem [shape: f32[5,128], index: 4, kind: input, shape index: {}]   ;;  %s2151_s5 = inlined_call_operand.hbm [shape: f32[2,64,128], index: 5, kind: output, shape index: {}]  }
   0x1   :  { %12 = vsyncpa [#allocation4 + $0x1], 0  ;;  %s1680_s18 = smov 0   ;;  %s1682_s19 = smov 0  }
   0x2   :  { %s1684_s20 = smov 0   ;;  %s1686_s21 = smov 0  }
   0x3 LB: > { %s1701_s22 = sadd.s32 4294967295, %s1642_s21   ;;  %s1189_s23 = sadd.s32 4294967294, %s1642_s21   ;;  %s1642_s21 = sphi %s1686_s21, %s2157_s21   ;;  %s1638_s20 = sphi %s1684_s20, %s2156_s20   ;;  %s1634_s19 = sphi %s1682_s19, %s2155_s19   ;;  %s1630_s18 = sphi %s1680_s18, %s2154_s18  }
   0x4   : > { %s1705_s24 = sadd.s32 1, %s1642_s21   ;;  %s135_s25 = sadd.s32 1, %s1638_s20 }
   0x5   : > { %s132_s26 = ssub.s32 %s1642_s21, %s1705_s24  ;;  %p145_p0 = scmp.ne.s32.totalorder %s1638_s20, %s1634_s19 }
   0x6   : > { %p133_p1 = scmp.eq.s32.totalorder %s132_s26, 0  ;;  %p146_p2 = scmp.eq.s32.totalorder %s1701_s22, 1 }
   0x7   : > { %p151_p3 = scmp.ne.s32.totalorder %s1634_s19, %s1630_s18  ;;  %p152_p4 = scmp.eq.s32.totalorder %s1189_s23, 1 }
   0x8   : > { %s1716_s27 = scalar_select %p133_p1, %s1638_s20, %s135_s25  }
   0x9   : > { %p1718_p5 = por %p146_p2, %p145_p0  ;;  %p1722_p6 = por %p152_p4, %p151_p3 }
   0xa   : > { %p1192_p7 = scmp.ge.s32.totalorder %s1642_s21, 1  ;;  %p190_p8 = scmp.lt.s32.totalorder %s1642_s21, 3 }
   0xc   : > { %p191_p9 = pnand %p1192_p7, %p190_p8 }
   0xd   : > { %p218_p10 = scmp.lt.s32.totalorder (!%p191_p9), %s1701_s22, 1  ;;  %s1645_s7 = smov (!%p191_p9), 64  }
   0xe   : > { %194 = sbr.rel (%p191_p9) target bundleno = 837 (0x345), region = 40  ;;  %s1646_s8 = smov (!%p191_p9), 32  }
   0xf   : > { %s215_s23 = sand.u32 (!%p191_p9), 1, %s1634_s19   ;;  %s1261_s6 = sshll.u32 (!%p191_p9), %s1701_s22, 10 }
  0x10   : > { %s1193_s26 = sshll.u32 (!%p191_p9), %s215_s23, 6  ;;  %s2098_s10 = scalar_lea.hbm (!%p191_p9), %s2151_s5, %s1261_s6 }
  0x11   : > { %s2079_s30 = scalar_lea.vmem (!%p191_p9), [#allocation3], %s1193_s26  ;;  %s1647_s12 = smov (!%p191_p9), [#allocation3]  }
  0x12   : > { %s1586_s13 = sshll.u32 (!%p191_p9), %s1647_s12, 4  ;;  %s1587_s13 = int_to_ptr.vmem [resolvable:$false] %s1586_s13 }
  0x13   : > { %v246_v0 = vld [vmem:[%s2147_s1 + $0x78] sm:$0xff]  ;;  %v245_v1 = vld [vmem:[%s2147_s1 + $0x70] sm:$0xff]  ;;  %v244_v2 = vld [vmem:[%s2147_s1 + $0x68] sm:$0xff]  ;;  %s219_s11 = scalar_select %p218_p10, %s1701_s22, 1  ;;  %vm370_vm0 = vcmask 253952   ;;  %vm379_vm1 = vcmask 778752  }
  0x14   : > { %1358 = vmatprep.subr.mxu0 %v246_v0  ;;  %v243_v3 = vld [vmem:[%s2147_s1 + $0x60] sm:$0xff]  ;;  %v242_v4 = vld [vmem:[%s2147_s1 + $0x58] sm:$0xff]  ;;  %v241_v6 = vld [vmem:[%s2147_s1 + $0x50] sm:$0xff]  ;;  %v1644_v31 = vmov 0.0   ;;  %vm365_vm2 = vcmask 785408   ;;  %vm420_vm3 = vcmask 523520  }
  0x15   : > { %1359 = vmatpush3.msra.mxu0 %v246_v0  ;;  %s1260_s14 = sshll.u32 %s219_s11, 6  ;;  %v240_v7 = vld [vmem:[%s2147_s1 + $0x48] sm:$0xff]  ;;  %v239_v8 = vld [vmem:[%s2147_s1 + $0x40] sm:$0xff]  ;;  %v238_v9 = vld [vmem:[%s2147_s1 + $0x38] sm:$0xff]  ;;  %372 = vst.msk [vmem:[#allocation2 + $0x10] sm:$0x1] %vm370_vm0, %v1644_v31 }
  0x16   : > { %1360 = vmatprep.subr.mxu0 %v245_v1  ;;  %s1745_s17 = scalar_lea.vmem %s2146_s0, %s1260_s14  ;;  %v237_v10 = vld [vmem:[%s2147_s1 + $0x30] sm:$0xff]  ;;  %v236_v11 = vld [vmem:[%s2147_s1 + $0x28] sm:$0xff]  ;;  %v235_v12 = vld [vmem:[%s2147_s1 + $0x20] sm:$0xff]  ;;  %381 = vst.msk [vmem:[#allocation2 + $0x17] sm:$0x1] %vm379_vm1, %v1644_v31  ;;  %vm429_vm4 = vcmask 260096  }
  0x17   : > { %1361 = vmatpush3.msra.mxu0 %v245_v1  ;;  %v1751_v5 = vld [vmem:[%s1745_s17] sm:$0xff]  ;;  %v234_v13 = vld [vmem:[%s2147_s1 + $0x18] sm:$0xff]  ;;  %v233_v14 = vld [vmem:[%s2147_s1 + $0x10] sm:$0xff]  ;;  %371 = vst.msk [vmem:[#allocation2 + $0x8] sm:$0x1] %vm370_vm0, %v1644_v31  ;;  %vm462_vm5 = vcmask 785921  }
  0x18   : > { %1362 = vmatprep.subr.mxu0 %v244_v2  ;;  %1390 = vmatprep.mubr.f32.mxu0 %v1751_v5  ;;  %v232_v15 = vld [vmem:[%s2147_s1 + $0x8] sm:$0xff]  ;;  %v231_v16 = vld [vmem:[%s2147_s1] sm:$0xff]  ;;  %v1791_v18 = vld [vmem:[%s1745_s17 + $0x10] sm:$0xff]  ;;  %373 = vst.msk [vmem:[#allocation2 + $0x18] sm:$0x1] %vm370_vm0, %v1644_v31  ;;  %vm959_vm6 = vcmask 261120  }
  0x19   : > { %1363 = vmatpush3.msra.mxu0 %v244_v2  ;;  %v1788_v17 = vld [vmem:[%s1745_s17 + $0x8] sm:$0xff]  ;;  %v1796_v19 = vld [vmem:[%s1745_s17 + $0x18] sm:$0xff]  ;;  %v1799_v20 = vld [vmem:[%s1745_s17 + $0x20] sm:$0xff]  ;;  %374 = vst.msk [vmem:[#allocation2 + $0x20] sm:$0x1] %vm370_vm0, %v1644_v31  ;;  %s2106_s22 = scalar_lea.sflag [#allocation4], %s215_s23 }
  0x1a   : > { %1364 = vmatprep.subr.mxu0 %v243_v3  ;;  %v1804_v21 = vld [vmem:[%s1745_s17 + $0x28] sm:$0xff]  ;;  %v1807_v22 = vld [vmem:[%s1745_s17 + $0x30] sm:$0xff]  ;;  %v1812_v23 = vld [vmem:[%s1745_s17 + $0x38] sm:$0xff]  ;;  %375 = vst.msk [vmem:[#allocation2 + $0x28] sm:$0x1] %vm370_vm0, %v1644_v31  ;;  %s1588_s14 = scalar_lea.vmem %s1587_s13, 2048 }
  0x1b   : > { %1365 = vmatpush3.msra.mxu0 %v243_v3  ;;  %v1208_v24 = vld [vmem:[%s2148_s2 + $0xb8] sm:$0xff]  ;;  %v1207_v25 = vld [vmem:[%s2148_s2 + $0xb0] sm:$0xff]  ;;  %v1206_v28 = vld [vmem:[%s2148_s2 + $0xa8] sm:$0xff]  ;;  %376 = vst.msk [vmem:[#allocation2 + $0x30] sm:$0x1] %vm370_vm0, %v1644_v31 }
  0x1c   : > { %1366 = vmatprep.subr.mxu0 %v242_v4  ;;  %1402 = vmatprep.subr.mxu1 %v1208_v24  ;;  %v1236_v26 = vld [vmem:[%s2148_s2 + $0x118] sm:$0xff]  ;;  %v1235_v27 = vld [vmem:[%s2148_s2 + $0x110] sm:$0xff]  ;;  %v1205_v29 = vld [vmem:[%s2148_s2 + $0xa0] sm:$0xff]  ;;  %377 = vst.msk [vmem:[#allocation2 + $0x38] sm:$0x1] %vm370_vm0, %v1644_v31 }
  0x1d   : > { %1367 = vmatpush3.msra.mxu0 %v242_v4  ;;  %1403 = vmatpush3.msra.mxu1 %v1208_v24  ;;  %v1204_v30 = vld [vmem:[%s2148_s2 + $0x98] sm:$0xff]  ;;  %378 = vst.msk [vmem:[#allocation2 + $0x40] sm:$0x1] %vm370_vm0, %v1644_v31  ;;  %v1234_v32 = vld [vmem:[%s2148_s2 + $0x108] sm:$0xff]  ;;  %v1203_v33 = vld [vmem:[%s2148_s2 + $0x90] sm:$0xff] }
  0x1e   : > { %1368 = vmatprep.subr.mxu0 %v241_v6  ;;  %1404 = vmatprep.subr.mxu1 %v1207_v25  ;;  %380 = vst.msk [vmem:[#allocation2 + $0xf] sm:$0x1] %vm379_vm1, %v1644_v31  ;;  %382 = vst.msk [vmem:[#allocation2 + $0x1f] sm:$0x1] %vm379_vm1, %v1644_v31  ;;  %v1233_v34 = vld [vmem:[%s2148_s2 + $0x100] sm:$0xff]  ;;  %v1202_v35 = vld [vmem:[%s2148_s2 + $0x88] sm:$0xff] }
  0x1f   : > { %1369 = vmatpush3.msra.mxu0 %v241_v6  ;;  %1405 = vmatpush3.msra.mxu1 %v1207_v25  ;;  %383 = vst.msk [vmem:[#allocation2 + $0x27] sm:$0x1] %vm379_vm1, %v1644_v31  ;;  %384 = vst.msk [vmem:[#allocation2 + $0x2f] sm:$0x1] %vm379_vm1, %v1644_v31  ;;  %v1232_v36 = vld [vmem:[%s2148_s2 + $0xf8] sm:$0xff]  ;;  %v1201_v37 = vld [vmem:[%s2148_s2 + $0x80] sm:$0xff] }
  0x20   : > { %1370 = vmatprep.subr.mxu0 %v240_v7  ;;  %1406 = vmatprep.subr.mxu1 %v1206_v28  ;;  %385 = vst.msk [vmem:[#allocation2 + $0x37] sm:$0x1] %vm379_vm1, %v1644_v31  ;;  %386 = vst.msk [vmem:[#allocation2 + $0x3f] sm:$0x1] %vm379_vm1, %v1644_v31  ;;  %v1231_v38 = vld [vmem:[%s2148_s2 + $0xf0] sm:$0xff]  ;;  %v1200_v40 = vld [vmem:[%s2148_s2 + $0x78] sm:$0xff] }
  0x21   : > { %1371 = vmatpush3.msra.mxu0 %v240_v7  ;;  %1407 = vmatpush3.msra.mxu1 %v1206_v28  ;;  %387 = vst.msk [vmem:[#allocation2 + $0x47] sm:$0x1] %vm379_vm1, %v1644_v31  ;;  %v1868_v39 = vld [vmem:[%s2150_s4 + $0x2] ss:$0 sm:$0xff]  ;;  %v1230_v41 = vld [vmem:[%s2148_s2 + $0xe8] sm:$0xff]  ;;  %v1199_v43 = vld [vmem:[%s2148_s2 + $0x70] sm:$0xff] }
  0x22   : > { %1372 = vmatprep.subr.mxu0 %v239_v8  ;;  %1408 = vmatprep.subr.mxu1 %v1205_v29  ;;  %v1229_v45 = vld [vmem:[%s2148_s2 + $0xe0] sm:$0xff]  ;;  %366 = vst.msk [vmem:[#allocation2] sm:$0xff] %vm365_vm2, %v1644_v31  ;;  %368 = vst.msk [vmem:[#allocation2 + $0x48] sm:$0xff] %vm365_vm2, %v1644_v31  ;;  %v1198_v47 = vld [vmem:[%s2148_s2 + $0x68] sm:$0xff] }
  0x23   : > { %1373 = vmatpush3.msra.mxu0 %v239_v8  ;;  %1409 = vmatpush3.msra.mxu1 %v1205_v29  ;;  %v1228_v50 = vld [vmem:[%s2148_s2 + $0xd8] sm:$0xff]  ;;  %v1197_v52 = vld [vmem:[%s2148_s2 + $0x60] sm:$0xff]  ;;  %v1227_v53 = vld [vmem:[%s2148_s2 + $0xd0] sm:$0xff] }
  0x24   : > { %1374 = vmatprep.subr.mxu0 %v238_v9  ;;  %1410 = vmatprep.subr.mxu1 %v1204_v30  ;;  %v1226_v58 = vld [vmem:[%s2148_s2 + $0xc8] sm:$0xff]  ;;  %v1912_v60 = vld [vmem:[%s2148_s2 + $0x58] sm:$0xff]  ;;  %v1225_v61 = vld [vmem:[%s2148_s2 + $0xc0] sm:$0xff] }
  0x25   : > { %1375 = vmatpush3.msra.mxu0 %v238_v9  ;;  %1411 = vmatpush3.msra.mxu1 %v1204_v30  ;;  %v489_v29 = vld [vmem:[%s2148_s2 + $0x50] sm:$0xff] }
  0x26   : > { %1376 = vmatprep.subr.mxu0 %v237_v10  ;;  %1412 = vmatprep.subr.mxu1 %v1203_v33 }
  0x27   : > { %1377 = vmatpush3.msra.mxu0 %v237_v10  ;;  %1413 = vmatpush3.msra.mxu1 %v1203_v33 }
  0x28   : > { %1378 = vmatprep.subr.mxu0 %v236_v11  ;;  %1414 = vmatprep.subr.mxu1 %v1202_v35 }
  0x29   : > { %1379 = vmatpush3.msra.mxu0 %v236_v11  ;;  %1415 = vmatpush3.msra.mxu1 %v1202_v35 }
  0x2a   : > { %1380 = vmatprep.subr.mxu0 %v235_v12  ;;  %1416 = vmatprep.subr.mxu1 %v1201_v37 }
  0x2b   : > { %1381 = vmatpush3.msra.mxu0 %v235_v12  ;;  %1417 = vmatpush3.msra.mxu1 %v1201_v37  ;;  %v487_v37 = vld [vmem:[%s2148_s2 + $0x40] sm:$0xff] }
  0x2c   : > { %1382 = vmatprep.subr.mxu0 %v234_v13  ;;  %1418 = vmatprep.subr.mxu1 %v1200_v40 }
  0x2d   : > { %1383 = vmatpush3.msra.mxu0 %v234_v13  ;;  %1419 = vmatpush3.msra.mxu1 %v1200_v40 }
  0x2e   : > { %1384 = vmatprep.subr.mxu0 %v233_v14  ;;  %1420 = vmatprep.subr.mxu1 %v1199_v43 }
  0x2f   : > { %1385 = vmatpush3.msra.mxu0 %v233_v14  ;;  %1421 = vmatpush3.msra.mxu1 %v1199_v43 }
  0x30   : > { %1386 = vmatprep.subr.mxu0 %v232_v15  ;;  %1422 = vmatprep.subr.mxu1 %v1198_v47 }
  0x31   : > { %1387 = vmatpush3.msra.mxu0 %v232_v15  ;;  %1423 = vmatpush3.msra.mxu1 %v1198_v47  ;;  %v483_v47 = vld [vmem:[%s2148_s2 + $0x20] sm:$0xff] }
  0x32   : > { %1388 = vmatprep.subr.mxu0 %v231_v16  ;;  %1424 = vmatprep.subr.mxu1 %v1197_v52 }
  0x33   : > { %1389 = vmatpush3.msra.mxu0 %v231_v16  ;;  %1425 = vmatpush3.msra.mxu1 %v1197_v52  ;;  %v480_v52 = vld [vmem:[%s2148_s2 + $0x8] sm:$0xff] }
  0x34   : > { %1391 = vmatmul.mubr.f32.vlgmr.msra.gmra.mxu0 %v1788_v17  ;;  %1474 = vmatprep.subr.mxu0 %v1236_v26 }
  0x35   : > { %1393 = vmatprep.mubr.f32.mxu0 %v1791_v18  ;;  %1475 = vmatpush3.msra.mxu0 %v1236_v26 }
  0x36   : > { %1476 = vmatprep.subr.mxu0 %v1235_v27  ;;  %1438 = vmatprep.subr.mxu1 %v1912_v60 }
  0x37   : > { %1477 = vmatpush3.msra.mxu0 %v1235_v27 }
  0x38   : > { %1394 = vmatmul.mubr.f32.gmra.mxu0 %v1796_v19  ;;  %1478 = vmatprep.subr.mxu0 %v1234_v32 }
  0x39   : > { %1396 = vmatprep.mubr.f32.mxu0 %v1799_v20  ;;  %1479 = vmatpush3.msra.mxu0 %v1234_v32  ;;  %v488_v32 = vld [vmem:[%s2148_s2 + $0x48] sm:$0xff] }
  0x3a   : > { %1480 = vmatprep.subr.mxu0 %v1233_v34 }
  0x3b   : > { %1481 = vmatpush3.msra.mxu0 %v1233_v34 }
  0x3c   : > { %1397 = vmatmul.mubr.f32.gmra.mxu0 %v1804_v21  ;;  %1482 = vmatprep.subr.mxu0 %v1232_v36 }
  0x3d   : > { %1399 = vmatprep.mubr.f32.mxu0 %v1807_v22  ;;  %1483 = vmatpush3.msra.mxu0 %v1232_v36 }
  0x3e   : > { %1484 = vmatprep.subr.mxu0 %v1231_v38 }
  0x3f   : > { %1485 = vmatpush3.msra.mxu0 %v1231_v38  ;;  %v486_v38 = vld [vmem:[%s2148_s2 + $0x38] sm:$0xff] }
  0x40   : > { %1400 = vmatmul.mubr.f32.gmra.mxu0 %v1812_v23  ;;  %1486 = vmatprep.subr.mxu0 %v1230_v41 }
  0x41   : > { %1487 = vmatpush3.msra.mxu0 %v1230_v41  ;;  %v485_v41 = vld [vmem:[%s2148_s2 + $0x30] sm:$0xff] }
  0x42   : > { %1488 = vmatprep.subr.mxu0 %v1229_v45 }
  0x43   : > { %1489 = vmatpush3.msra.mxu0 %v1229_v45 }
  0x44   : > { %1490 = vmatprep.subr.mxu0 %v1228_v50 }
  0x45   : > { %1491 = vmatpush3.msra.mxu0 %v1228_v50 }
  0x46   : > { %1492 = vmatprep.subr.mxu0 %v1227_v53 }
  0x47   : > { %1493 = vmatpush3.msra.mxu0 %v1227_v53  ;;  %v479_v53 = vld [vmem:[%s2148_s2] sm:$0xff] }
  0x48   : > { %1494 = vmatprep.subr.mxu0 %v1226_v58 }
  0x49   : > { %1495 = vmatpush3.msra.mxu0 %v1226_v58  ;;  %v951_v58 = vld [vmem:[%s2149_s3 + $0x8] sm:$0xff] }
  0x4a   : > { %1496 = vmatprep.subr.mxu0 %v1225_v61 }
  0x4b   : > { %1497 = vmatpush3.msra.mxu0 %v1225_v61 }
  0xf4   : > { %v1392_v42 = vpop.f32.mrf.mxu0 }
  0xf5   : > { %v324_v44 = vadd.f32 %v1392_v42, %v1868_v39 }
  0xf6   : > { %v318_v46 = vpop.f32.mrf.mxu0 }
  0xf7   : > { %v1888_v48 = vmax.f32 %v324_v44, 0.0  ;;  %v319_v49 = vadd.f32 %v1868_v39, %v318_v46  ;;  %v484_v46 = vld [vmem:[%s2148_s2 + $0x28] sm:$0xff] }
  0xf8   : > { %v1395_v51 = vpop.f32.mrf.mxu0 }
  0xf9   : > { %440 = vrot.lane.b32.xlu1 %v1888_v48, %s1645_s7  ;;  %398 = vrot.lane.b32.xlu0 %v1888_v48, %s1646_s8  ;;  %v357_v55 = vmax.f32 %v319_v49, 0.0  ;;  %v334_v56 = vadd.f32 %v1395_v51, %v1868_v39  ;;  %v481_v49 = vld [vmem:[%s2148_s2 + $0x10] sm:$0xff] }
  0xfa   : > { %v328_v54 = vpop.f32.mrf.mxu0 }
  0xfb   : > { %v329_v57 = vadd.f32 %v1868_v39, %v328_v54  ;;  %v360_v62 = vmax.f32 %v334_v56, 0.0  ;;  %v471_v54 = vld [vmem:[#allocation2] sm:$0xff]  ;;  %v953_v56 = vld [vmem:[%s2149_s3 + $0x18] sm:$0xff] }
  0xfc   : > { %v1398_v59 = vpop.f32.mrf.mxu0  ;;  %1510 = vmatprep.subr.mxu0 %v953_v56 }
  0xfd   : > { %438 = vrot.lane.b32.xlu1 %v357_v55, %s1645_s7  ;;  %396 = vrot.lane.b32.xlu0 %v357_v55, %s1646_s8  ;;  %v359_v63 = vmax.f32 %v329_v57, 0.0  ;;  %v344_v1 = vadd.f32 %v1398_v59, %v1868_v39  ;;  %v952_v57 = vld [vmem:[%s2149_s3 + $0x10] sm:$0xff]  ;;  %v950_v59 = vld [vmem:[%s2149_s3] sm:$0xff] }
  0xfe   : > { %v338_v0 = vpop.f32.mrf.mxu0 }
  0xff   : > { %v339_v2 = vadd.f32 %v1868_v39, %v338_v0  ;;  %v362_v4 = vmax.f32 %v344_v1, 0.0 }
 0x100   : > { %v1401_v3 = vpop.f32.mrf.mxu0 }
 0x101   : > { %402 = vrot.lane.b32.xlu1 %v360_v62, %s1646_s8  ;;  %400 = vrot.lane.b32.xlu0 %v359_v63, %s1646_s8  ;;  %v361_v6 = vmax.f32 %v339_v2, 0.0  ;;  %v354_v8 = vadd.f32 %v1401_v3, %v1868_v39 }
 0x102   : > { %v348_v7 = vpop.f32.mrf.mxu0 }
 0x103   : > { %v349_v9 = vadd.f32 %v1868_v39, %v348_v7  ;;  %v1932_v10 = vmax.f32 %v354_v8, 0.0 }
 0x105   : > { %444 = vrot.lane.b32.xlu1 %v360_v62, %s1645_s7  ;;  %442 = vrot.lane.b32.xlu0 %v359_v63, %s1645_s7  ;;  %v1934_v11 = vmax.f32 %v349_v9, 0.0 }
 0x109   : > { %406 = vrot.lane.b32.xlu1 %v362_v4, %s1646_s8  ;;  %404 = vrot.lane.b32.xlu0 %v361_v6, %s1646_s8 }
 0x10d   : > { %448 = vrot.lane.b32.xlu1 %v362_v4, %s1645_s7  ;;  %446 = vrot.lane.b32.xlu0 %v361_v6, %s1645_s7 }
 0x111   : > { %410 = vrot.lane.b32.xlu1 %v1932_v10, %s1646_s8  ;;  %408 = vrot.lane.b32.xlu0 %v1934_v11, %s1646_s8 }
 0x115   : > { %452 = vrot.lane.b32.xlu1 %v1932_v10, %s1645_s7  ;;  %450 = vrot.lane.b32.xlu0 %v1934_v11, %s1645_s7  ;;  %s1127_s7 = sshll.u32 %s2079_s30, 4  ;;  %s2100_s7 = int_to_ptr.vmem [resolvable:$true] %s1127_s7 }
 0x116   : > { %s1582_s11 = scalar_lea.vmem %s2100_s7, 1024  ;;  %p1589_p0 = scmp.lt.s32.totalorder %s2100_s7, %s1587_s13 }
 0x117   : > { %p1583_p11 = scmp.ne.s32.totalorder %s2100_s7, %s1582_s11  ;;  %p1590_p1 = scmp.lt.s32.totalorder %s1588_s14, %s1582_s11 }
 0x119   : > { %p1584_p12 = pnand %p1583_p11, %p1718_p5  ;;  %p1591_p2 = por %p1590_p1, %p1589_p0 }
 0x11b   : > { %p1585_p13 = pneg %p1584_p12 }
 0x11d   : > { %p1592_p3 = pnand %p1591_p2, %p1585_p13 }
 0x16b   : > { %v441_v12 = vpop.permute.xlu1 %440  ;;  %v399_v13 = vpop.permute.xlu0 %398 }
 0x16c   : > { %422 = vst.msk [vmem:[#allocation2 + $0x10] sm:$0xff] %vm420_vm3, %v399_v13 }
 0x16d   : > { %431 = vst.msk [vmem:[#allocation2 + $0x11] sm:$0x7f] %vm429_vm4, %v1888_v48  ;;  %v482_v48 = vld [vmem:[%s2148_s2 + $0x18] sm:$0xff] }
 0x16e   : > { %464 = vst.msk [vmem:[#allocation2 + $0xf] sm:$0xfe] %vm462_vm5, %v441_v12  ;;  %v1245_v12 = vld [vmem:[%s2150_s4 + $0x3] ss:$0 sm:$0xff] }
 0x16f   : > { %v439_v14 = vpop.permute.xlu1 %438  ;;  %v397_v15 = vpop.permute.xlu0 %396 }
 0x170   : > { %421 = vst.msk [vmem:[#allocation2 + $0x8] sm:$0xff] %vm420_vm3, %v397_v15 }
 0x171   : > { %430 = vst.msk [vmem:[#allocation2 + $0x9] sm:$0x7f] %vm429_vm4, %v357_v55  ;;  %v778_v55 = vld [vmem:[#allocation2 + $0x48] sm:$0xff] }
 0x172   : > { %463 = vst.msk [vmem:[#allocation2 + $0x7] sm:$0xfe] %vm462_vm5, %v439_v14 }
 0x173   : > { %v403_v16 = vpop.permute.xlu1 %402  ;;  %v401_v24 = vpop.permute.xlu0 %400 }
 0x174   : > { %424 = vst.msk [vmem:[#allocation2 + $0x20] sm:$0xff] %vm420_vm3, %v403_v16  ;;  %423 = vst.msk [vmem:[#allocation2 + $0x18] sm:$0xff] %vm420_vm3, %v401_v24 }
 0x175   : > { %433 = vst.msk [vmem:[#allocation2 + $0x21] sm:$0x7f] %vm429_vm4, %v360_v62  ;;  %432 = vst.msk [vmem:[#allocation2 + $0x19] sm:$0x7f] %vm429_vm4, %v359_v63  ;;  %v1955_v25 = vld [vmem:[#allocation2 + $0x10] sm:$0xff] }
 0x176   : > { %1498 = vmatprep.mubr.msk.f32.mxu0 %vm365_vm2, %v1955_v25 }
 0x177   : > { %v445_v26 = vpop.permute.xlu1 %444  ;;  %v443_v27 = vpop.permute.xlu0 %442 }
 0x178   : > { %466 = vst.msk [vmem:[#allocation2 + $0x1f] sm:$0xfe] %vm462_vm5, %v445_v26  ;;  %465 = vst.msk [vmem:[#allocation2 + $0x17] sm:$0xfe] %vm462_vm5, %v443_v27 }
 0x179   : > { %v1961_v28 = vld [vmem:[#allocation2 + $0x8] sm:$0xff] }
 0x17a   : > { %1426 = vmatprep.mubr.msk.f32.mxu1 %vm365_vm2, %v1961_v28 }
 0x17b   : > { %v407_v30 = vpop.permute.xlu1 %406  ;;  %1427 = vmatmul.mubr.msk.f32.vlgmr.msra.gmra.mxu1 %vm365_vm2, %v1955_v25  ;;  %v405_v31 = vpop.permute.xlu0 %404 }
 0x17c   : > { %426 = vst.msk [vmem:[#allocation2 + $0x30] sm:$0xff] %vm420_vm3, %v407_v30  ;;  %425 = vst.msk [vmem:[#allocation2 + $0x28] sm:$0xff] %vm420_vm3, %v405_v31  ;;  %1439 = vmatpush3.msra.mxu1 %v1912_v60 }
 0x17d   : > { %435 = vst.msk [vmem:[#allocation2 + $0x31] sm:$0x7f] %vm429_vm4, %v362_v4  ;;  %434 = vst.msk [vmem:[#allocation2 + $0x29] sm:$0x7f] %vm429_vm4, %v361_v6  ;;  %1440 = vmatprep.subr.mxu1 %v489_v29 }
 0x17e   : > { %1441 = vmatpush3.msra.mxu1 %v489_v29 }
 0x17f   : > { %v449_v33 = vpop.permute.xlu1 %448  ;;  %v447_v34 = vpop.permute.xlu0 %446  ;;  %v1978_v35 = vld [vmem:[#allocation2 + $0x18] sm:$0xff]  ;;  %v1980_v36 = vld [vmem:[#allocation2 + $0x20] sm:$0xff]  ;;  %1442 = vmatprep.subr.mxu1 %v488_v32 }
 0x180   : > { %468 = vst.msk [vmem:[#allocation2 + $0x2f] sm:$0xfe] %vm462_vm5, %v449_v33  ;;  %467 = vst.msk [vmem:[#allocation2 + $0x27] sm:$0xfe] %vm462_vm5, %v447_v34  ;;  %1429 = vmatprep.mubr.msk.f32.mxu1 %vm365_vm2, %v1978_v35  ;;  %1499 = vmatmul.mubr.msk.f32.vlgmr.msra.gmra.mxu0 %vm365_vm2, %v1978_v35 }
 0x181   : > { %1430 = vmatmul.mubr.msk.f32.gmra.mxu1 %vm365_vm2, %v1980_v36  ;;  %1501 = vmatprep.mubr.msk.f32.mxu0 %vm365_vm2, %v1980_v36 }
 0x182   : > { %1443 = vmatpush3.msra.mxu1 %v488_v32  ;;  %1511 = vmatpush3.msra.mxu0 %v953_v56 }
 0x183   : > { %v411_v39 = vpop.permute.xlu1 %410  ;;  %1444 = vmatprep.subr.mxu1 %v487_v37  ;;  %v409_v40 = vpop.permute.xlu0 %408  ;;  %1512 = vmatprep.subr.mxu0 %v952_v57 }
 0x184   : > { %428 = vst.msk [vmem:[#allocation2 + $0x40] sm:$0xff] %vm420_vm3, %v411_v39  ;;  %427 = vst.msk [vmem:[#allocation2 + $0x38] sm:$0xff] %vm420_vm3, %v409_v40  ;;  %1445 = vmatpush3.msra.mxu1 %v487_v37  ;;  %1513 = vmatpush3.msra.mxu0 %v952_v57 }
 0x185   : > { %437 = vst.msk [vmem:[#allocation2 + $0x41] sm:$0x7f] %vm429_vm4, %v1932_v10  ;;  %436 = vst.msk [vmem:[#allocation2 + $0x39] sm:$0x7f] %vm429_vm4, %v1934_v11  ;;  %1446 = vmatprep.subr.mxu1 %v486_v38  ;;  %1514 = vmatprep.subr.mxu0 %v951_v58 }
 0x186   : > { %1447 = vmatpush3.msra.mxu1 %v486_v38  ;;  %1515 = vmatpush3.msra.mxu0 %v951_v58 }
 0x187   : > { %v453_v42 = vpop.permute.xlu1 %452  ;;  %1448 = vmatprep.subr.mxu1 %v485_v41  ;;  %v451_v43 = vpop.permute.xlu0 %450  ;;  %v495_v44 = vld [vmem:[#allocation2 + $0x28] sm:$0xff]  ;;  %v496_v45 = vld [vmem:[#allocation2 + $0x30] sm:$0xff]  ;;  %1516 = vmatprep.subr.mxu0 %v950_v59 }
 0x188   : > { %470 = vst.msk [vmem:[#allocation2 + $0x3f] sm:$0xfe] %vm462_vm5, %v453_v42  ;;  %469 = vst.msk [vmem:[#allocation2 + $0x37] sm:$0xfe] %vm462_vm5, %v451_v43  ;;  %1432 = vmatprep.mubr.msk.f32.mxu1 %vm365_vm2, %v495_v44  ;;  %1449 = vmatpush3.msra.mxu1 %v485_v41 }
 0x189   : > { %1502 = vmatmul.mubr.msk.f32.gmra.mxu0 %vm365_vm2, %v495_v44  ;;  %1433 = vmatmul.mubr.msk.f32.gmra.mxu1 %vm365_vm2, %v496_v45 }
 0x18a   : > { %1450 = vmatprep.subr.mxu1 %v484_v46  ;;  %1504 = vmatprep.mubr.msk.f32.mxu0 %vm365_vm2, %v496_v45 }
 0x18b   : > { %1451 = vmatpush3.msra.mxu1 %v484_v46  ;;  %1517 = vmatpush3.msra.mxu0 %v950_v59 }
 0x18c   : > { %1452 = vmatprep.subr.mxu1 %v483_v47 }
 0x18d   : > { %1453 = vmatpush3.msra.mxu1 %v483_v47 }
 0x18e   : > { %1454 = vmatprep.subr.mxu1 %v482_v48 }
 0x18f   : > { %1455 = vmatpush3.msra.mxu1 %v482_v48  ;;  %v497_v50 = vld [vmem:[#allocation2 + $0x38] sm:$0xff]  ;;  %v498_v51 = vld [vmem:[#allocation2 + $0x40] sm:$0xff] }
 0x190   : > { %1456 = vmatprep.subr.mxu1 %v481_v49  ;;  %1435 = vmatprep.mubr.msk.f32.mxu1 %vm365_vm2, %v497_v50 }
 0x191   : > { %1457 = vmatpush3.msra.mxu1 %v481_v49  ;;  %1505 = vmatmul.mubr.msk.f32.gmra.mxu0 %vm365_vm2, %v497_v50 }
 0x192   : > { %1436 = vmatmul.mubr.msk.f32.gmra.mxu1 %vm365_vm2, %v498_v51  ;;  %1458 = vmatprep.subr.mxu1 %v480_v52 }
 0x193   : > { %1507 = vmatprep.mubr.msk.f32.mxu0 %vm365_vm2, %v498_v51  ;;  %1459 = vmatpush3.msra.mxu1 %v480_v52 }
 0x194   : > { %1460 = vmatprep.subr.mxu1 %v479_v53  ;;  %1462 = vmatprep.mubr.msk.f32.mxu1 %vm365_vm2, %v471_v54 }
 0x195   : > { %1461 = vmatpush3.msra.mxu1 %v479_v53  ;;  %1508 = vmatmul.mubr.msk.f32.gmra.mxu0 %vm365_vm2, %v778_v55 }
 0x196   : > { %1463 = vmatmul.mubr.msk.f32.vlgmr.msra.gmra.mxu1 %vm365_vm2, %v1961_v28  ;;  %1530 = vmatprep.subr.mxu1 %v953_v56 }
 0x197   : > { %1465 = vmatprep.mubr.msk.f32.mxu1 %vm365_vm2, %v1955_v25  ;;  %1534 = vmatpush3.msra.mxu1 %v953_v56 }
 0x198   : > { %1531 = vmatprep.subr.mxu1 %v952_v57 }
 0x199   : > { %1535 = vmatpush3.msra.mxu1 %v952_v57 }
 0x19a   : > { %1466 = vmatmul.mubr.msk.f32.gmra.mxu1 %vm365_vm2, %v1978_v35  ;;  %1532 = vmatprep.subr.mxu1 %v951_v58 }
 0x19b   : > { %1468 = vmatprep.mubr.msk.f32.mxu1 %vm365_vm2, %v1980_v36  ;;  %1536 = vmatpush3.msra.mxu1 %v951_v58 }
 0x19c   : > { %1533 = vmatprep.subr.mxu1 %v950_v59 }
 0x19d   : > { %1537 = vmatpush3.msra.mxu1 %v950_v59 }
 0x19e   : > { %1469 = vmatmul.mubr.msk.f32.gmra.mxu1 %vm365_vm2, %v495_v44 }
 0x19f   : > { %1471 = vmatprep.mubr.msk.f32.mxu1 %vm365_vm2, %v496_v45 }
 0x1a2   : > { %1472 = vmatmul.mubr.msk.f32.gmra.mxu1 %vm365_vm2, %v497_v50 }
 0x23b   : > { %v1428_v60 = vpop.f32.mrf.mxu1 }
 0x23d   : > { %v602_v61 = vpop.f32.mrf.mxu1 }
 0x240   : > { %v1500_v1 = vpop.f32.mrf.mxu0 }
 0x241   : > { %v1431_v62 = vpop.f32.mrf.mxu1 }
 0x242   : > { %v882_v4 = vpop.f32.mrf.mxu0 }
 0x243   : > { %v612_v63 = vpop.f32.mrf.mxu1 }
 0x249   : > { %v1434_v0 = vpop.f32.mrf.mxu1  ;;  %v1503_v7 = vpop.f32.mrf.mxu0 }
 0x24b   : > { %v622_v2 = vpop.f32.mrf.mxu1  ;;  %v892_v14 = vpop.f32.mrf.mxu0 }
 0x251   : > { %v1506_v25 = vpop.f32.mrf.mxu0 }
 0x252   : > { %v1437_v3 = vpop.f32.mrf.mxu1 }
 0x253   : > { %v902_v35 = vpop.f32.mrf.mxu0 }
 0x254   : > { %v632_v6 = vpop.f32.mrf.mxu1 }
 0x255   : > { %v1509_v43 = vpop.f32.mrf.mxu0 }
 0x256   : > { %v1464_v8 = vpop.f32.mrf.mxu1 }
 0x257   : > { %v737_v9 = vadd.f32 %v1464_v8, %v1428_v60  ;;  %v912_v53 = vpop.f32.mrf.mxu0 }
 0x258   : > { %v731_v10 = vpop.f32.mrf.mxu1 }
 0x259   : > { %v922_v11 = vadd.f32 %v1500_v1, %v737_v9  ;;  %v732_v13 = vadd.f32 %v731_v10, %v602_v61  ;;  %v1246_v61 = vld [vmem:[%s2150_s4 + $0x4] ss:$0 sm:$0xff] }
 0x25a   : > { %v1467_v15 = vpop.f32.mrf.mxu1 }
 0x25b   : > { %v921_v16 = vadd.f32 %v882_v4, %v732_v13  ;;  %v747_v24 = vadd.f32 %v1467_v15, %v1431_v62  ;;  %v935_v26 = vadd.f32 %v1245_v12, %v922_v11 }
 0x25c   : > { %v741_v27 = vpop.f32.mrf.mxu1 }
 0x25d   : > { %v934_v28 = vadd.f32 %v1245_v12, %v921_v16  ;;  %v924_v29 = vadd.f32 %v1503_v7, %v747_v24  ;;  %v742_v30 = vadd.f32 %v741_v27, %v612_v63  ;;  %v943_v36 = vmax.f32 %v935_v26, 0.0 }
 0x25e   : > { %v1470_v31 = vpop.f32.mrf.mxu1 }
 0x25f   : > { %v942_v32 = vmax.f32 %v934_v28, 0.0  ;;  %v923_v33 = vadd.f32 %v892_v14, %v742_v30  ;;  %v757_v34 = vadd.f32 %v1470_v31, %v1434_v0  ;;  %v937_v37 = vadd.f32 %v1245_v12, %v924_v29 }
 0x260   : > { %v751_v38 = vpop.f32.mrf.mxu1 }
 0x261   : > { %v936_v39 = vadd.f32 %v1245_v12, %v923_v33  ;;  %v926_v40 = vadd.f32 %v1506_v25, %v757_v34  ;;  %v752_v41 = vadd.f32 %v751_v38, %v622_v2  ;;  %1518 = vmatprep.mubr.msk.f32.mxu0 %vm959_vm6, %v942_v32  ;;  %v945_v47 = vmax.f32 %v937_v37, 0.0 }
 0x262   : > { %v1473_v42 = vpop.f32.mrf.mxu1  ;;  %1519 = vmatmul.mubr.msk.f32.vlgmr.msra.gmra.mxu0 %vm959_vm6, %v943_v36 }
 0x263   : > { %v944_v44 = vmax.f32 %v936_v39, 0.0  ;;  %v925_v45 = vadd.f32 %v902_v35, %v752_v41  ;;  %v767_v46 = vadd.f32 %v1473_v42, %v1437_v3  ;;  %v939_v48 = vadd.f32 %v1245_v12, %v926_v40 }
 0x264   : > { %v761_v49 = vpop.f32.mrf.mxu1 }
 0x265   : > { %v938_v50 = vadd.f32 %v1245_v12, %v925_v45  ;;  %v928_v51 = vadd.f32 %v1509_v43, %v767_v46  ;;  %v762_v52 = vadd.f32 %v761_v49, %v632_v6  ;;  %1521 = vmatprep.mubr.msk.f32.mxu1 %vm959_vm6, %v944_v44  ;;  %v947_v56 = vmax.f32 %v939_v48, 0.0 }
 0x266   : > { %1522 = vmatmul.mubr.msk.f32.vlgmr.msra.gmra.mxu1 %vm959_vm6, %v945_v47 }
 0x267   : > { %v946_v54 = vmax.f32 %v938_v50, 0.0  ;;  %v927_v55 = vadd.f32 %v912_v53, %v762_v52  ;;  %v941_v57 = vadd.f32 %v1245_v12, %v928_v51 }
 0x269   : > { %v940_v58 = vadd.f32 %v1245_v12, %v927_v55  ;;  %1524 = vmatprep.mubr.msk.f32.mxu1 %vm959_vm6, %v946_v54  ;;  %v949_v60 = vmax.f32 %v941_v57, 0.0 }
 0x26a   : > { %1525 = vmatmul.mubr.msk.f32.gmra.mxu1 %vm959_vm6, %v947_v56 }
 0x26b   : > { %v948_v59 = vmax.f32 %v940_v58, 0.0 }
 0x26d   : > { %1527 = vmatprep.mubr.msk.f32.mxu1 %vm959_vm6, %v948_v59 }
 0x26e   : > { %1528 = vmatmul.mubr.msk.f32.gmra.mxu1 %vm959_vm6, %v949_v60 }
 0x322   : > { %v1520_v62 = vpop.f32.mrf.mxu0 }
 0x323   : > { %v1056_v63 = vadd.f32 %v1520_v62, %v1246_v61 }
 0x324   : > { %v1050_v0 = vpop.f32.mrf.mxu0 }
 0x325   : > { %v1090_v1 = vadd.f32 %v1056_v63, %v1788_v17  ;;  %v1051_v2 = vadd.f32 %v1246_v61, %v1050_v0 }
 0x326   : > { %v1523_v3 = vpop.f32.mrf.mxu1 }
 0x327   : > { %v1098_v4 = vmax.f32 %v1090_v1, 0.0  ;;  %v1089_v6 = vadd.f32 %v1051_v2, %v1751_v5  ;;  %v1066_v7 = vadd.f32 %v1523_v3, %v1246_v61 }
 0x328   : > { %v1060_v8 = vpop.f32.mrf.mxu1 }
 0x329   : > { %1106 = vst [vmem:[%s2079_s30 + $0x8] sm:$0xff] %v1098_v4  ;;  %v1097_v9 = vmax.f32 %v1089_v6, 0.0  ;;  %v1092_v10 = vadd.f32 %v1066_v7, %v1796_v19  ;;  %v1061_v11 = vadd.f32 %v1246_v61, %v1060_v8 }
 0x32a   : > { %v1526_v12 = vpop.f32.mrf.mxu1 }
 0x32b   : > { %1105 = vst [vmem:[%s2079_s30] sm:$0xff] %v1097_v9  ;;  %v1100_v17 = vmax.f32 %v1092_v10, 0.0  ;;  %v1091_v13 = vadd.f32 %v1061_v11, %v1791_v18  ;;  %v1076_v5 = vadd.f32 %v1526_v12, %v1246_v61 }
 0x32c   : > { %v1070_v14 = vpop.f32.mrf.mxu1 }
 0x32d   : > { %1108 = vst [vmem:[%s2079_s30 + $0x18] sm:$0xff] %v1100_v17  ;;  %v1099_v15 = vmax.f32 %v1091_v13, 0.0  ;;  %v1094_v16 = vadd.f32 %v1076_v5, %v1804_v21  ;;  %v1071_v24 = vadd.f32 %v1246_v61, %v1070_v14 }
 0x32e   : > { %v1529_v25 = vpop.f32.mrf.mxu1 }
 0x32f   : > { %1107 = vst [vmem:[%s2079_s30 + $0x10] sm:$0xff] %v1099_v15  ;;  %v1102_v19 = vmax.f32 %v1094_v16, 0.0  ;;  %v1093_v26 = vadd.f32 %v1071_v24, %v1799_v20  ;;  %v1086_v27 = vadd.f32 %v1529_v25, %v1246_v61 }
 0x330   : > { %v1080_v18 = vpop.f32.mrf.mxu1 }
 0x331   : > { %1110 = vst [vmem:[%s2079_s30 + $0x28] sm:$0xff] %v1102_v19  ;;  %v1101_v28 = vmax.f32 %v1093_v26, 0.0  ;;  %v1096_v29 = vadd.f32 %v1086_v27, %v1812_v23  ;;  %v1081_v30 = vadd.f32 %v1246_v61, %v1080_v18 }
 0x333   : > { %1109 = vst [vmem:[%s2079_s30 + $0x20] sm:$0xff] %v1101_v28  ;;  %v1104_v21 = vmax.f32 %v1096_v29, 0.0  ;;  %v1095_v31 = vadd.f32 %v1081_v30, %v1807_v22 }
 0x335   : > { %1112 = vst [vmem:[%s2079_s30 + $0x38] sm:$0xff] %v1104_v21  ;;  %v1103_v20 = vmax.f32 %v1095_v31, 0.0 }
 0x337   : > { %1111 = vst [vmem:[%s2079_s30 + $0x30] sm:$0xff] %v1103_v20 }
 0x338   : > { %1595 = shalt.err (!%p1592_p3)
}
 0x339   : > { %s1596_s15 = scalar_lea.hbm %s2098_s10, 1024  ;;  %s1600_s25 = scalar_lea.hbm %s2151_s5, 2048 }
 0x33a   : > { %p1597_p4 = scmp.ne.s32.totalorder %s2098_s10, %s1596_s15  ;;  %p1601_p9 = scmp.lt.s32.totalorder %s2098_s10, %s2151_s5 }
 0x33b   : > { %p1602_p10 = scmp.lt.s32.totalorder %s1600_s25, %s1596_s15 }
 0x33c   : > { %p1598_p7 = pnand %p1597_p4, %p1718_p5 }
 0x33d   : > { %p1603_p11 = por %p1602_p10, %p1601_p9 }
 0x33e   : > { %p1599_p8 = pneg %p1598_p7 }
 0x340   : > { %p1604_p12 = pnand %p1603_p11, %p1599_p8 }
 0x342   : > { %1607 = shalt.err (!%p1604_p12)
}
 0x343   : > { %s1648_s30 = smov 128   ;;  %s1649_s6 = smov 8  }
 0x344   : > { %1538 = dma.vmem_to_hbm [thread:$0]  (%p1718_p5), %s2100_s7, 1024, %s2098_s10, %s2106_s22, %s1648_s30, %s1648_s30, %s1649_s6  }
 0x345 PF: > { %p1544_p13 = scmp.ge.s32.totalorder %s1642_s21, 2  ;;  %s1142_s8 = sand.u32 1, %s1630_s18  }
 0x346   : > { %s1143_s9 = scalar_lea.sflag [#allocation4], %s1142_s8 }
 0x347   : > { %p1541_p0 = pnand %p1544_p13, %p1722_p6 }
 0x349   : > { %p1542_p1 = pneg %p1541_p0 }
 0x34b   : > { %1625 = dma.done.wait (%p1542_p1), %s1143_s9, 1024  }
 0x34c   : > { %1627 = vsyncadd (%p1542_p1), %s1143_s9, 4294966272  ;;  %p15_p2 = scmp.ge.s32.totalorder %s1705_s24, 4   ;;  %s2154_s18 = smov %s1634_s19 }
 0x34d   : > { %s2155_s19 = smov %s1638_s20  ;;  %s2156_s20 = smov %s1716_s27 }
 0x34e   : > { %s2157_s21 = smov %s1705_s24  ;;  %17 = sbr.rel (!%p15_p2) target bundleno = 3 (0x3), region = 80 }
 0x353   :  { %1148 = vsyncpa [#allocation4], 1 }
 0x354   :  { %1150 = vsyncpa [#allocation4 + $0x1], 1 }

</bundles_post_ra>
